<compile_context>
chip_gen: v7x
topology: tpu7x:2x2x1
jax: 0.10.0
libtpu: 0.0.40
codegen_flags: <defaults>
</compile_context>

<pallas_src>
import jax
import jax.numpy as jnp
from jax.experimental import pallas as pl
from jax.experimental.pallas import tpu as pltpu


def _round_up(v, m):
    return ((v + m - 1) // m) * m


def _mlp_kernel(x_ref, w1_ref, b1_ref, w2_ref, b2_ref, o_ref, acc_ref):
    # x_ref: (TM, H); w1_ref: (H, TI); b1_ref: (1, TI) f32
    # w2_ref: (TI, H); b2_ref: (1, H) f32; o_ref: (TM, H); acc_ref: (TM, H) f32
    k = pl.program_id(1)

    @pl.when(k == 0)
    def _():
        acc_ref[...] = jnp.zeros_like(acc_ref)

    # fc1 partial-columns matmul (f32 acc), bias, tanh-GELU == gelu_pytorch_tanh.
    h = jnp.dot(x_ref[...], w1_ref[...], preferred_element_type=jnp.float32)
    h = jax.nn.gelu(h + b1_ref[...], approximate=True)
    # fc2 partial-rows matmul accumulated in f32 across k tiles.
    acc_ref[...] += jnp.dot(h.astype(w2_ref.dtype), w2_ref[...],
                            preferred_element_type=jnp.float32)

    @pl.when(k == pl.num_programs(1) - 1)
    def _():
        o_ref[...] = (acc_ref[...] + b2_ref[...]).astype(o_ref.dtype)


def siglip_mlp(x, fc1_w, fc1_b, fc2_w, fc2_b, *, tm=256, ti=512,
               compute_dtype=None, out_dtype=None, vmem_limit_bytes=None):
    """SiglipMLP forward.

    x      : (..., H)
    fc1_w  : (I, H)  (PyTorch fc1.weight),  fc1_b: (I,)
    fc2_w  : (H, I)  (PyTorch fc2.weight),  fc2_b: (H,)
    Production on v6e/v7x: pass compute_dtype=jnp.bfloat16 (f32 accumulation is
    kept inside the kernel either way).
    """
    H = x.shape[-1]
    I = fc1_w.shape[0]
    assert fc1_w.shape == (I, H) and fc2_w.shape == (H, I)
    assert fc1_b.shape == (I,) and fc2_b.shape == (H,)

    if compute_dtype is None:
        compute_dtype = x.dtype
    if out_dtype is None:
        out_dtype = x.dtype
    compute_dtype = jnp.dtype(compute_dtype)
    out_dtype = jnp.dtype(out_dtype)

    lead = x.shape[:-1]
    x2 = x.reshape(-1, H).astype(compute_dtype)
    M = x2.shape[0]

    # Token-axis tile: sublane-aligned, megacore-aware (>= 2 tiles when M allows
    # so both v7x TensorCores receive work on the "parallel" axis). No padding
    # of x: the partial edge block is handled by Pallas (OOB rows dropped).
    sub = 16 if compute_dtype.itemsize <= 2 else 8
    if M <= tm:
        tm = _round_up(pl.cdiv(M, 2), sub) if M >= 2 * sub else _round_up(M, sub)
    else:
        tm = _round_up(tm, sub)
    n_m = pl.cdiv(M, tm)

    # Intermediate-axis tile: multiple of 128 when streaming so every k block is
    # (8,128)-legal; VMEM becomes independent of intermediate_size.
    ti = min(ti, I)
    if ti < I:
        ti = max(128, (ti // 128) * 128)
    n_k = pl.cdiv(I, ti)
    Ip = n_k * ti

    # Pre-transpose PyTorch weights once into row-major matmul layout; biases
    # stay f32 (tiny, free accuracy). Zero-pad weights along I to a TI multiple
    # (padded columns/rows contribute exactly zero to the result).
    w1_t = fc1_w.T.astype(compute_dtype)              # (H, I)
    w2_t = fc2_w.T.astype(compute_dtype)              # (I, H)
    b1_m = fc1_b.reshape(1, I).astype(jnp.float32)
    b2_m = fc2_b.reshape(1, H).astype(jnp.float32)
    if Ip != I:
        w1_t = jnp.pad(w1_t, ((0, 0), (0, Ip - I)))
        w2_t = jnp.pad(w2_t, ((0, Ip - I), (0, 0)))
        b1_m = jnp.pad(b1_m, ((0, 0), (0, Ip - I)))

    # Explicit scoped-VMEM budget: working-set estimate with headroom, capped
    # below v7x's 64 MiB physical VMEM (and >= the 32 MiB v6e default).
    if vmem_limit_bytes is None:
        cb, ob = compute_dtype.itemsize, out_dtype.itemsize
        est = (2 * tm * H * cb          # x tile (double-buffered)
               + 2 * H * ti * cb        # w1 slab
               + 2 * ti * 4             # b1 slab
               + 2 * ti * H * cb        # w2 slab
               + 2 * H * 4              # b2
               + 2 * tm * H * ob        # out tile
               + tm * H * 4             # f32 accumulator scratch
               + 2 * tm * ti * 4)       # (tm, ti) intermediate + cast copy
        vmem_limit_bytes = int(min(max(2 * est, 32 * 2**20), 56 * 2**20))

    out = pl.pallas_call(
        _mlp_kernel,
        out_shape=jax.ShapeDtypeStruct((M, H), out_dtype),
        grid_spec=pltpu.PrefetchScalarGridSpec(
            num_scalar_prefetch=0,
            grid=(n_m, n_k),
            in_specs=[
                pl.BlockSpec((tm, H), lambda i, k: (i, 0)),   # x tile (reused over k)
                pl.BlockSpec((H, ti), lambda i, k: (0, k)),   # w1 slab (streams)
                pl.BlockSpec((1, ti), lambda i, k: (0, k)),   # b1 slab (f32)
                pl.BlockSpec((ti, H), lambda i, k: (k, 0)),   # w2 slab (streams)
                pl.BlockSpec((1, H), lambda i, k: (0, 0)),    # b2 (tiny, resident)
            ],
            out_specs=pl.BlockSpec((tm, H), lambda i, k: (i, 0)),
            scratch_shapes=[pltpu.VMEM((tm, H), jnp.float32)],
        ),
        compiler_params=pltpu.CompilerParams(
            dimension_semantics=("parallel", "arbitrary"),
            vmem_limit_bytes=vmem_limit_bytes,
        ),
    )(x2, w1_t, b1_m, w2_t, b2_m)

    return out.reshape(*lead, H)


def reference(x, fc1_w, fc1_b, fc2_w, fc2_b):
    """Pure-JAX reference matching the PyTorch SiglipMLP forward."""
    h = x @ fc1_w.T + fc1_b
    h = jax.nn.gelu(h, approximate=True)
    return h @ fc2_w.T + fc2_b


if __name__ == "__main__":
    # Small SigLIP-like config. I=192 with ti=128 exercises k-tiling (n_k=2)
    # and the zero-padded weight path (Ip=256).
    B, S, H, I = 2, 8, 32, 192

    key = jax.random.PRNGKey(0)
    k1, k2, k3, k4, k5, k6 = jax.random.split(key, 6)
    x = jax.random.normal(k1, (B, S, H), dtype=jnp.float32)
    fc1_w = jax.random.normal(k2, (I, H), dtype=jnp.float32) * 0.05
    fc1_b = jax.random.normal(k3, (I,), dtype=jnp.float32) * 0.05
    fc2_w = jax.random.normal(k4, (H, I), dtype=jnp.float32) * 0.05
    fc2_b = jax.random.normal(k5, (H,), dtype=jnp.float32) * 0.05

    ref = reference(x, fc1_w, fc1_b, fc2_w, fc2_b)

    # f32 path: M=16 -> two token tiles of 8; two k tiles of 128.
    out = siglip_mlp(x, fc1_w, fc1_b, fc2_w, fc2_b, ti=128)
    out = jax.block_until_ready(out)
    assert out.shape == (B, S, H)
    assert jnp.allclose(out, ref, atol=1e-4, rtol=1e-4)

    # bf16 MXU path (recommended production default on v6e/v7x); f32 accumulation.
    out_bf = siglip_mlp(x, fc1_w, fc1_b, fc2_w, fc2_b, ti=128,
                        compute_dtype=jnp.bfloat16, out_dtype=jnp.float32)
    out_bf = jax.block_until_ready(out_bf)
    assert jnp.allclose(out_bf, ref, atol=5e-2, rtol=5e-2)

    # Odd token count: M=18 -> tm=16, partial edge token tile, no activation pad.
    x_odd = jax.random.normal(k6, (B, 9, H), dtype=jnp.float32)
    ref_odd = reference(x_odd, fc1_w, fc1_b, fc2_w, fc2_b)
    out_odd = jax.block_until_ready(
        siglip_mlp(x_odd, fc1_w, fc1_b, fc2_w, fc2_b, ti=128))
    assert out_odd.shape == (B, 9, H)
    assert jnp.allclose(out_odd, ref_odd, atol=1e-4, rtol=1e-4)

    print("KERNEL_OK")
</pallas_src>

<mosaic_0001>
module attributes {stable_mosaic.version = 11 : i64} {
  func.func @_mlp_kernel(%arg0: i32, %arg1: i32, %arg2: memref<8x32xf32, #tpu.memory_space<vmem>>, %arg3: memref<32x128xf32, #tpu.memory_space<vmem>>, %arg4: memref<1x128xf32, #tpu.memory_space<vmem>>, %arg5: memref<128x32xf32, #tpu.memory_space<vmem>>, %arg6: memref<1x32xf32, #tpu.memory_space<vmem>>, %arg7: memref<8x32xf32, #tpu.memory_space<vmem>>, %arg8: memref<8x32xf32, #tpu.memory_space<vmem>>) attributes {dimension_semantics = [#tpu.dimension_semantics<parallel>, #tpu.dimension_semantics<arbitrary>], iteration_bounds = array<i64: 2, 2>, scalar_prefetch = 0 : i64, scratch_operands = 1 : i64, tpu.core_type = #tpu.core_type<tc>, window_params = [{transform_indices = @transform_0, window_bounds = array<i64: 8, 32>}, {transform_indices = @transform_1, window_bounds = array<i64: 32, 128>}, {transform_indices = @transform_2, window_bounds = array<i64: 1, 128>}, {transform_indices = @transform_3, window_bounds = array<i64: 128, 32>}, {pipeline_mode = #tpu.pipeline_mode<synchronous>, transform_indices = @transform_4, window_bounds = array<i64: 1, 32>}, {transform_indices = @transform_5, window_bounds = array<i64: 8, 32>}]} {
    %c0_i32 = arith.constant 0 : i32
    %0 = arith.cmpi eq, %arg1, %c0_i32 : i32
    %1 = arith.extui %0 : i1 to i32
    %c0_i32_0 = arith.constant 0 : i32
    %2 = arith.cmpi ne, %1, %c0_i32_0 : i32
    scf.if %2 {
      %cst_18 = arith.constant 0.000000e+00 : f32
      %30 = vector.broadcast %cst_18 : f32 to vector<8x32xf32>
      %c0_19 = arith.constant 0 : index
      %c0_20 = arith.constant 0 : index
      %31 = vector.load %arg8[%c0_19, %c0_20] : memref<8x32xf32, #tpu.memory_space<vmem>>, vector<8x32xf32>
      tpu.vector_store %arg8[%c0_19, %c0_20], %30 {strides = array<i32>} : memref<8x32xf32, #tpu.memory_space<vmem>>, vector<8x32xf32>,
    } else {
    }
    %c0 = arith.constant 0 : index
    %c0_1 = arith.constant 0 : index
    %3 = vector.load %arg2[%c0, %c0_1] : memref<8x32xf32, #tpu.memory_space<vmem>>, vector<8x32xf32>
    %c0_2 = arith.constant 0 : index
    %c0_3 = arith.constant 0 : index
    %4 = vector.load %arg3[%c0_2, %c0_3] : memref<32x128xf32, #tpu.memory_space<vmem>>, vector<32x128xf32>
    %cst = arith.constant dense<0.000000e+00> : vector<8x128xf32>
    %5 = tpu.matmul %3, %4, %cst {dimension_numbers = #tpu.dot_dimension_numbers<[1], [0], [0], [1], [0, 0, 1, 1], [], []>} : vector<8x32xf32>, vector<32x128xf32>, vector<8x128xf32> -> vector<8x128xf32>
    %c0_4 = arith.constant 0 : index
    %c0_5 = arith.constant 0 : index
    %6 = vector.load %arg4[%c0_4, %c0_5] : memref<1x128xf32, #tpu.memory_space<vmem>>, vector<1x128xf32>
    %7 = vector.broadcast %6 : vector<1x128xf32> to vector<8x128xf32>
    %8 = arith.addf %5, %7 : vector<8x128xf32>
    %9 = arith.mulf %8, %8 : vector<8x128xf32>
    %10 = arith.mulf %8, %9 : vector<8x128xf32>
    %cst_6 = arith.constant 4.471500e-02 : f32
    %11 = vector.broadcast %cst_6 : f32 to vector<8x128xf32>
    %12 = arith.mulf %11, %10 : vector<8x128xf32>
    %13 = arith.addf %8, %12 : vector<8x128xf32>
    %cst_7 = arith.constant 0.797884583 : f32
    %14 = vector.broadcast %cst_7 : f32 to vector<8x128xf32>
    %15 = arith.mulf %14, %13 : vector<8x128xf32>
    %16 = math.tanh %15 : vector<8x128xf32>
    %cst_8 = arith.constant 1.000000e+00 : f32
    %17 = vector.broadcast %cst_8 : f32 to vector<8x128xf32>
    %18 = arith.addf %17, %16 : vector<8x128xf32>
    %cst_9 = arith.constant 5.000000e-01 : f32
    %19 = vector.broadcast %cst_9 : f32 to vector<8x128xf32>
    %20 = arith.mulf %19, %18 : vector<8x128xf32>
    %21 = arith.mulf %8, %20 : vector<8x128xf32>
    %c0_10 = arith.constant 0 : index
    %c0_11 = arith.constant 0 : index
    %22 = vector.load %arg8[%c0_10, %c0_11] : memref<8x32xf32, #tpu.memory_space<vmem>>, vector<8x32xf32>
    %c0_12 = arith.constant 0 : index
    %c0_13 = arith.constant 0 : index
    %23 = vector.load %arg5[%c0_12, %c0_13] : memref<128x32xf32, #tpu.memory_space<vmem>>, vector<128x32xf32>
    %cst_14 = arith.constant dense<0.000000e+00> : vector<8x32xf32>
    %24 = tpu.matmul %21, %23, %cst_14 {dimension_numbers = #tpu.dot_dimension_numbers<[1], [0], [0], [1], [0, 0, 1, 1], [], []>} : vector<8x128xf32>, vector<128x32xf32>, vector<8x32xf32> -> vector<8x32xf32>
    %25 = arith.addf %22, %24 : vector<8x32xf32>
    %c0_15 = arith.constant 0 : index
    %c0_16 = arith.constant 0 : index
    %26 = vector.load %arg8[%c0_15, %c0_16] : memref<8x32xf32, #tpu.memory_space<vmem>>, vector<8x32xf32>
    tpu.vector_store %arg8[%c0_15, %c0_16], %25 {strides = array<i32>} : memref<8x32xf32, #tpu.memory_space<vmem>>, vector<8x32xf32>,
    %c1_i32 = arith.constant 1 : i32
    %27 = arith.cmpi eq, %arg1, %c1_i32 : i32
    %28 = arith.extui %27 : i1 to i32
    %c0_i32_17 = arith.constant 0 : i32
    %29 = arith.cmpi ne, %28, %c0_i32_17 : i32
    scf.if %29 {
      %c0_18 = arith.constant 0 : index
      %c0_19 = arith.constant 0 : index
      %30 = vector.load %arg8[%c0_18, %c0_19] : memref<8x32xf32, #tpu.memory_space<vmem>>, vector<8x32xf32>
      %c0_20 = arith.constant 0 : index
      %c0_21 = arith.constant 0 : index
      %31 = vector.load %arg6[%c0_20, %c0_21] : memref<1x32xf32, #tpu.memory_space<vmem>>, vector<1x32xf32>
      %32 = vector.broadcast %31 : vector<1x32xf32> to vector<8x32xf32>
      %33 = arith.addf %30, %32 : vector<8x32xf32>
      %c0_22 = arith.constant 0 : index
      %c0_23 = arith.constant 0 : index
      %34 = vector.load %arg7[%c0_22, %c0_23] : memref<8x32xf32, #tpu.memory_space<vmem>>, vector<8x32xf32>
      tpu.vector_store %arg7[%c0_22, %c0_23], %33 {strides = array<i32>} : memref<8x32xf32, #tpu.memory_space<vmem>>, vector<8x32xf32>,
    } else {
    }
    return
  }
  func.func @transform_0(%arg0: i32, %arg1: i32) -> (i32, i32) {
    %c0_i32 = arith.constant 0 : i32
    %c0_i32_0 = arith.constant 0 : i32
    return %arg0, %c0_i32 : i32, i32
  }
  func.func @transform_1(%arg0: i32, %arg1: i32) -> (i32, i32) {
    %c0_i32 = arith.constant 0 : i32
    %c0_i32_0 = arith.constant 0 : i32
    return %c0_i32, %arg1 : i32, i32
  }
  func.func @transform_2(%arg0: i32, %arg1: i32) -> (i32, i32) {
    %c0_i32 = arith.constant 0 : i32
    %c0_i32_0 = arith.constant 0 : i32
    return %c0_i32, %arg1 : i32, i32
  }
  func.func @transform_3(%arg0: i32, %arg1: i32) -> (i32, i32) {
    %c0_i32 = arith.constant 0 : i32
    %c0_i32_0 = arith.constant 0 : i32
    return %arg1, %c0_i32 : i32, i32
  }
  func.func @transform_4(%arg0: i32, %arg1: i32) -> (i32, i32) {
    %c0_i32 = arith.constant 0 : i32
    %c0_i32_0 = arith.constant 0 : i32
    %c0_i32_1 = arith.constant 0 : i32
    return %c0_i32, %c0_i32_0 : i32, i32
  }
  func.func @transform_5(%arg0: i32, %arg1: i32) -> (i32, i32) {
    %c0_i32 = arith.constant 0 : i32
    %c0_i32_0 = arith.constant 0 : i32
    return %arg0, %c0_i32 : i32, i32
  }
}

</mosaic_0001>

<bundles_post_ra>
// kernel: tpu_custom_call.1
= control target key start
LH: loop header
LB: loop body
LE: loop exit
PB: predicated region body
PF: predicated region fallthrough
CT: control target
= control target key end

     0   :  { %s1241_s0 = inlined_call_operand.vmem [shape: f32[16,32], index: 0, kind: input, shape index: {}]   ;;  %s1242_s1 = inlined_call_operand.vmem [shape: f32[32,256], index: 1, kind: input, shape index: {}]   ;;  %s1243_s2 = inlined_call_operand.vmem [shape: f32[1,256], index: 2, kind: input, shape index: {}]   ;;  %s1244_s3 = inlined_call_operand.vmem [shape: f32[256,32], index: 3, kind: input, shape index: {}]   ;;  %s1245_s4 = inlined_call_operand.vmem [shape: f32[1,32], index: 4, kind: input, shape index: {}]   ;;  %s1246_s5 = inlined_call_operand.hbm [shape: f32[16,32], index: 5, kind: output, shape index: {}]  }
   0x1   :  { %1253 = sst [smem:[#allocation14_spill]] %s1242_s1 }
   0x2   :  { %10 = vsyncpa [#allocation5], 0 }
   0x3   :  { %12 = vsyncpa [#allocation5 + $0x1], 0  ;;  %s1020_s18 = smov 0   ;;  %s1022_s19 = smov 0  }
   0x4   :  { %s1024_s20 = smov 0   ;;  %s1026_s21 = smov 0  }
   0x5   :  { %s1028_s22 = smov 0   ;;  %s1030_s23 = smov 0  }
   0x6   :  { %s1032_s24 = smov 0   ;;  %s1034_s25 = smov 0  }
   0x7   :  { %s1036_s26 = smov 0   ;;  %s1038_s27 = smov 0  }
   0x8 LB: > { %1254 = sst [smem:[#allocation7_spill]] %s963_s22  ;;  %s661_s28 = sadd.s32 4294967295, %s983_s27   ;;  %s983_s27 = sphi %s1038_s27, %s18_s27   ;;  %s979_s26 = sphi %s1036_s26, %s1276_s26   ;;  %s975_s25 = sphi %s1034_s25, %s1271_s25   ;;  %s971_s24 = sphi %s1032_s24, %s1270_s24   ;;  %s967_s23 = sphi %s1030_s23, %s1269_s23   ;;  %s963_s22 = sphi %s1028_s22, %s1268_s22   ;;  %s959_s21 = sphi %s1026_s21, %s1267_s21   ;;  %s955_s20 = sphi %s1024_s20, %s1275_s20   ;;  %s951_s19 = sphi %s1022_s19, %s1274_s19   ;;  %s947_s18 = sphi %s1020_s18, %s1273_s18  }
   0x9   : > { %1255 = sst [smem:[#allocation8_spill]] %s975_s25  ;;  %s662_s29 = sadd.s32 4294967294, %s983_s27  }
   0xa   : > { %1256 = sst [smem:[#allocation9_spill]] %s979_s26  ;;  %s27_s30 = sadd.s32 1, %s975_s25 }
   0xb   : > { %s30_s6 = sadd.s32 1, %s979_s26  ;;  %p28_p0 = scmp.ge.s32.totalorder %s27_s30, 2 }
   0xc   : > { %s63_s7 = sadd.s32 1, %s963_s22  ;;  %p70_p1 = scmp.ne.s32.totalorder %s963_s22, %s959_s21 }
   0xd   : > { %p71_p2 = scmp.eq.s32.totalorder %s983_s27, 0  ;;  %s1278_s30 = smov (%p28_p0, %s27_s30), 0 }
   0xe   : > { %1257 = sst [smem:[#allocation10_spill]] %s1278_s30  ;;  %s1280_s6 = smov (!%p28_p0, %s30_s6), %s979_s26 }
   0xf   : > { %s60_s8 = ssub.s32 %s975_s25, %s1278_s30  ;;  %p1083_p3 = por %p71_p2, %p70_p1 }
  0x10   : > { %p32_p4 = scmp.ge.s32.totalorder %s1280_s6, 2  ;;  %p61_p5 = scmp.eq.s32.totalorder %s60_s8, 0 }
  0x11   : > { %s162_s10 = sadd.s32 1, %s955_s20  ;;  %p172_p6 = scmp.ne.s32.totalorder %s955_s20, %s951_s19 }
  0x12   : > { %s1282_s6 = smov (%p32_p4, %s1280_s6), 0  ;;  %p173_p7 = scmp.eq.s32.totalorder %s661_s28, 3 }
  0x13   : > { %1259 = sst [smem:[#allocation11_spill]] %s1282_s6  ;;  %s159_s12 = ssub.s32 %s979_s26, %s1282_s6 }
  0x14   : > { %s1093_s11 = scalar_select %p61_p5, %s963_s22, %s63_s7  }
  0x15   : > { %p160_p8 = scmp.eq.s32.totalorder %s159_s12, 0  ;;  %p178_p9 = scmp.ne.s32.totalorder %s951_s19, %s947_s18 }
  0x16   : > { %1260 = sst [smem:[#allocation12_spill]] %s1093_s11  ;;  %p1099_p10 = por %p173_p7, %p172_p6 }
  0x17   : > { %p179_p11 = scmp.eq.s32.totalorder %s662_s29, 3  ;;  %p664_p13 = scmp.ge.s32.totalorder %s983_s27, 4 }
  0x18   : > { %s1104_s14 = scalar_select %p160_p8, %s955_s20, %s162_s10  }
  0x19   : > { %p1106_p12 = por %p179_p11, %p178_p9  ;;  %198 = sbr.rel (%p664_p13) target bundleno = 44 (0x2c), region = 20 }
  0x1a   : > { %1262 = sst [smem:[#allocation13_spill]] %s1104_s14 }
  0x20   : > { %208 = sbr.rel (!%p1083_p3) target bundleno = 44 (0x2c), region = 28  ;;  %s210_s16 = sand.u32 (%p1083_p3), 1, %s963_s22  }
  0x21   : > { %s666_s17 = sshll.u32 (%p1083_p3), %s975_s25, 3  ;;  %s665_s28 = sshll.u32 (%p1083_p3), %s210_s16, 5 }
  0x22   : > { %s1264_s1 = sld [smem:[#allocation14_spill]] (%p1083_p3)  ;;  %s212_s10 = scalar_lea.vmem (%p1083_p3), [#allocation3], %s665_s28 }
  0x28   : > { %s214_s29 = scalar_lea.vmem %s1264_s1, %s666_s17 }
  0x29   : > { %v248_v0 = vld [vmem:[%s214_s29] sm:$0xff]  ;;  %v250_v1 = vld [vmem:[%s214_s29 + $0x10] sm:$0xff] }
  0x2a   : > { %v252_v2 = vld [vmem:[%s214_s29 + $0x20] sm:$0xff]  ;;  %249 = vst [vmem:[%s212_s10] sm:$0xff] %v248_v0  ;;  %251 = vst [vmem:[%s212_s10 + $0x8] sm:$0xff] %v250_v1  ;;  %v254_v3 = vld [vmem:[%s214_s29 + $0x30] sm:$0xff] }
  0x2b   : > { %253 = vst [vmem:[%s212_s10 + $0x10] sm:$0xff] %v252_v2  ;;  %255 = vst [vmem:[%s212_s10 + $0x18] sm:$0xff] %v254_v3 }
  0x2c PF: > { %p667_p0 = scmp.ge.s32.totalorder %s983_s27, 1  ;;  %p275_p1 = scmp.lt.s32.totalorder %s983_s27, 5 }
  0x2e   : > { %p276_p2 = pnand %p667_p0, %p275_p1 }
  0x2f   : > { %s282_s9 = sand.u32 (!%p276_p2), 1, %s959_s21   ;;  %s1248_s12 = sand.u32 (!%p276_p2), 1, %s951_s19  }
  0x30   : > { %279 = sbr.rel (%p276_p2) target bundleno = 567 (0x237), region = 74  ;;  %s668_s16 = sshll.u32 (!%p276_p2), %s282_s9, 5 }
  0x31   : > { %s1124_s17 = sshll.u32 (!%p276_p2), %s1248_s12, 3  ;;  %p321_p3 = scmp.lt.s32.totalorder (!%p276_p2), %s971_s24, 1 }
  0x32   : > { %p325_p4 = scmp.lt.s32.totalorder (!%p276_p2), %s967_s23, 1  ;;  %s671_s28 = sshll.u32 (!%p276_p2), %s967_s23, 4 }
  0x33   : > { %p329_p5 = scmp.lt.s32.totalorder (!%p276_p2), %s671_s28, 31  ;;  %s284_s22 = scalar_lea.vmem (!%p276_p2), [#allocation3], %s668_s16 }
  0x34   : > { %s320_s14 = scalar_lea.vmem (!%p276_p2), [#allocation4], %s1124_s17  ;;  %p673_p6 = scmp.ne.s32.totalorder (!%p276_p2), %s967_s23, 0 }
  0x37   : > { %s322_s7 = scalar_select %p321_p3, %s971_s24, 1 }
  0x38   : > { %s1131_s8 = scalar_select %p325_p4, %s967_s23, 1 }
  0x39   : > { %s670_s29 = sshll.u32 %s322_s7, 3  ;;  %s1284_s28 = smov (!%p329_p5, %s671_s28), 31  ;;  %vm338_vm0 = vcmask (!%p673_p6), 261120   ;;  %v985_v4 = vmov (!%p673_p6), 0.0  }
  0x3a   : > { %s1136_s6 = scalar_lea.vmem %s1241_s0, %s670_s29  ;;  %s327_s12 = scalar_lea.vmem %s1243_s2, %s1131_s8  ;;  %339 = vst.msk [vmem:[#allocation2] sm:$0xff] (!%p673_p6), %vm338_vm0, %v985_v4 }
  0x3b   : > { %s672_s30 = sshll.u32 %s1284_s28, 3  ;;  %337 = sbr.rel (%p673_p6) target bundleno = 66 (0x42), region = 82 }
  0x3c   : > { %s1145_s11 = scalar_lea.vmem %s1244_s3, %s672_s30 }
  0x42 PF: > { %v341_v5 = vld [vmem:[%s284_s22] sm:$0xff]  ;;  %v342_v6 = vld [vmem:[%s284_s22 + $0x8] sm:$0xff]  ;;  %v343_v7 = vld [vmem:[%s284_s22 + $0x10] sm:$0xff]  ;;  %v986_v8 = vmov 0.0|0.0   ;;  %vm987_vm1 = vmmov 0   ;;  %v988_v11 = vmov 0.0  }
  0x43   : > { %750 = vmatprep.subr.bf16.mxu0 %v986_v8  ;;  %v751_v9 = vpack.c.bf16 %v342_v6, %v341_v5  ;;  %v344_v10 = vld [vmem:[%s284_s22 + $0x18] sm:$0xff]  ;;  %712 = vmatprep.mubr.msk.f32.mxu0 %vm987_vm1, %v988_v11  ;;  %v437_v13 = vld [vmem:[%s1145_s11 + $0x8] sm:$0xff]  ;;  %vm352_vm2 = vcmask 261120   ;;  %v438_v17 = vld [vmem:[%s1145_s11 + $0x10] sm:$0xff]  ;;  %p676_p7 = scmp.ne.s32.totalorder %s967_s23, 1 }
  0x44   : > { %v436_v12 = vld [vmem:[%s1145_s11] sm:$0xff]  ;;  %756 = vmatprep.subr.bf16.mxu1 %v986_v8  ;;  %747 = vmatprep.mubr.msk.f32.mxu1 %vm987_vm1, %v988_v11  ;;  %v754_v14 = vpack.c.bf16 %v344_v10, %v343_v7  ;;  %v439_v18 = vld [vmem:[%s1145_s11 + $0x18] sm:$0xff]  ;;  %v441_v21 = vld [vmem:[%s1145_s11 + $0x28] sm:$0xff] }
  0x45   : > { %752 = vmatpush3.bf16.msra.mxu0 %v751_v9  ;;  %v757_v15 = vpack.c.bf16 %v437_v13, %v436_v12  ;;  %v340_v16 = vld [vmem:[%s1136_s6] sm:$0xff]  ;;  %v760_v19 = vpack.c.bf16 %v439_v18, %v438_v17  ;;  %v442_v23 = vld [vmem:[%s1145_s11 + $0x30] sm:$0xff]  ;;  %v443_v24 = vld [vmem:[%s1145_s11 + $0x38] sm:$0xff] }
  0x46   : > { %753 = vmatprep.subr.bf16.mxu0 %v986_v8  ;;  %v440_v20 = vld [vmem:[%s1145_s11 + $0x20] sm:$0xff]  ;;  %v766_v25 = vpack.c.bf16 %v443_v24, %v442_v23  ;;  %v445_v27 = vld [vmem:[%s1145_s11 + $0x48] sm:$0xff]  ;;  %v446_v29 = vld [vmem:[%s1145_s11 + $0x50] sm:$0xff] }
  0x47   : > { %758 = vmatpush3.bf16.msra.mxu1 %v757_v15  ;;  %v763_v22 = vpack.c.bf16 %v441_v21, %v440_v20  ;;  %v444_v26 = vld [vmem:[%s1145_s11 + $0x40] sm:$0xff]  ;;  %v447_v30 = vld [vmem:[%s1145_s11 + $0x58] sm:$0xff]  ;;  %v449_v33 = vld [vmem:[%s1145_s11 + $0x68] sm:$0xff] }
  0x48   : > { %759 = vmatprep.subr.bf16.mxu1 %v986_v8  ;;  %v769_v28 = vpack.c.bf16 %v445_v27, %v444_v26  ;;  %v772_v31 = vpack.c.bf16 %v447_v30, %v446_v29  ;;  %v448_v32 = vld [vmem:[%s1145_s11 + $0x60] sm:$0xff]  ;;  %v450_v35 = vld [vmem:[%s1145_s11 + $0x70] sm:$0xff]  ;;  %v451_v36 = vld [vmem:[%s1145_s11 + $0x78] sm:$0xff] }
  0x49   : > { %755 = vmatpush3.bf16.msra.mxu0 %v754_v14  ;;  %v775_v34 = vpack.c.bf16 %v449_v33, %v448_v32  ;;  %v778_v37 = vpack.c.bf16 %v451_v36, %v450_v35  ;;  %v674_v38 = vld [vmem:[%s327_s12] ss:$0 sm:$0xff] }
  0x4a   : > { %v435_v51 = vld [vmem:[#allocation2] sm:$0xff] }
  0x4b   : > { %761 = vmatpush3.bf16.msra.mxu1 %v760_v19  ;;  %v677_v56 = vld [vmem:[%s1245_s4] ss:$0 sm:$0xff] (!%p676_p7) }
  0x4c   : > { %713 = vmatmul.mubr.msk.f32.vlgmr.msra.gmra.mrb[0].mxu0 %vm352_vm2, %v340_v16  ;;  %762 = vmatprep.subr.bf16.mxu1 %v986_v8 }
  0x4f   : > { %764 = vmatpush3.bf16.msra.mxu1 %v763_v22 }
  0x50   : > { %765 = vmatprep.subr.bf16.mxu1 %v986_v8 }
  0x53   : > { %767 = vmatpush3.bf16.msra.mxu1 %v766_v25 }
  0x54   : > { %768 = vmatprep.subr.bf16.mxu1 %v986_v8 }
  0x57   : > { %770 = vmatpush3.bf16.msra.mxu1 %v769_v28 }
  0x58   : > { %771 = vmatprep.subr.bf16.mxu1 %v986_v8 }
  0x5b   : > { %773 = vmatpush3.bf16.msra.mxu1 %v772_v31 }
  0x5c   : > { %774 = vmatprep.subr.bf16.mxu1 %v986_v8 }
  0x5f   : > { %776 = vmatpush3.bf16.msra.mxu1 %v775_v34 }
  0x60   : > { %777 = vmatprep.subr.bf16.mxu1 %v986_v8 }
  0x63   : > { %779 = vmatpush3.bf16.msra.mxu1 %v778_v37 }
 0x11f   : > { %v422_v39 = vpop.f32.mrb[0].mxu0 }
 0x120   : > { %v423_v40 = vadd.f32 %v674_v38, %v422_v39  ;;  %v714_v41 = vpop.f32.mrb[1].mxu0 }
 0x122   : > { %v426_v42 = vmul.f32 %v423_v40, %v423_v40 }
 0x124   : > { %v427_v43 = vmul.f32 %v426_v42, %v423_v40 }
 0x126   : > { %v428_v44 = vmul.f32 0.044715, %v427_v43 }
 0x128   : > { %v429_v45 = vadd.f32 %v428_v44, %v423_v40 }
 0x12a   : > { %v430_v46 = vmul.f32 0.7978846, %v429_v45 }
 0x12c   : > { %871 = vtanh.f32 %v430_v46 }
 0x136   : > { %v872_v47 = vpop.eup %871 }
 0x137   : > { %v432_v48 = vadd.f32 1.0, %v872_v47 }
 0x139   : > { %v433_v49 = vmul.f32 0.5, %v432_v48 }
 0x13b   : > { %v434_v50 = vmul.f32 %v433_v49, %v423_v40 }
 0x13d   : > { %748 = vmatmul.mubr.f32.vlgmr.msra.gmra.mrb[0].mxu1 %v434_v50 }
 0x20d   : > { %527 = sbr.rel (%p676_p7) target bundleno = 542 (0x21e), region = 86 }
 0x210   : > { %v518_v52 = vpop.f32.mrb[0].mxu1 }
 0x211   : > { %v522_v53 = vadd.f32 %v518_v52, %v435_v51  ;;  %v749_v54 = vpop.f32.mrb[1].mxu1 }
 0x213   : > { %523 = vst.msk [vmem:[#allocation2] sm:$0xff] %vm352_vm2, %v522_v53 }
 0x21a   : > { %v528_v55 = vld [vmem:[#allocation2] sm:$0xff] }
 0x21b   : > { %v536_v57 = vadd.f32 %v677_v56, %v528_v55 }
 0x21d   : > { %537 = vst.msk [vmem:[%s320_s14] sm:$0xff] %vm352_vm2, %v536_v57 }
 0x21e PF: > { %s679_s30 = sshll.u32 %s971_s24, 7  ;;  %s552_s12 = sshll.u32 %s320_s14, 4  ;;  %s553_s12 = int_to_ptr.vmem [resolvable:$true] %s552_s12 }
 0x21f   : > { %s1184_s23 = scalar_lea.hbm %s1246_s5, %s679_s30  ;;  %s1265_s16 = sand.u32 1, %s951_s19  }
 0x220   : > { %s539_s28 = scalar_lea.sflag [#allocation5], %s1265_s16  ;;  %s873_s7 = scalar_lea.vmem %s553_s12, 128 }
 0x221   : > { %p874_p8 = scmp.ne.s32.totalorder %s553_s12, %s873_s7  ;;  %s989_s8 = smov [#allocation4]  }
 0x222   : > { %s877_s29 = sshll.u32 %s989_s8, 4  ;;  %s878_s29 = int_to_ptr.vmem [resolvable:$false] %s877_s29 }
 0x223   : > { %p875_p9 = pnand %p874_p8, %p1099_p10  ;;  %s879_s10 = scalar_lea.vmem %s878_s29, 256 }
 0x224   : > { %p880_p13 = scmp.lt.s32.totalorder %s553_s12, %s878_s29  ;;  %p881_p0 = scmp.lt.s32.totalorder %s879_s10, %s873_s7 }
 0x225   : > { %p876_p11 = pneg %p875_p9 }
 0x226   : > { %p882_p1 = por %p881_p0, %p880_p13 }
 0x228   : > { %p883_p2 = pnand %p882_p1, %p876_p11 }
 0x22a   : > { %886 = shalt.err (!%p883_p2)
}
 0x22b   : > { %s887_s24 = scalar_lea.hbm %s1184_s23, 128  ;;  %s891_s21 = scalar_lea.hbm %s1246_s5, 256 }
 0x22c   : > { %p888_p3 = scmp.ne.s32.totalorder %s1184_s23, %s887_s24  ;;  %p892_p6 = scmp.lt.u32.totalorder %s1184_s23, %s1246_s5 }
 0x22d   : > { %p893_p7 = scmp.lt.u32.totalorder %s891_s21, %s887_s24  ;;  %p895_p9 = scmp.lt.u32.totalorder %s887_s24, %s1184_s23 }
 0x22e   : > { %p889_p4 = pnand %p888_p3, %p1099_p10 }
 0x22f   : > { %p894_p8 = por %p893_p7, %p892_p6 }
 0x230   : > { %p890_p5 = pneg %p889_p4 }
 0x231   : > { %p896_p11 = por %p895_p9, %p894_p8 }
 0x233   : > { %p897_p13 = pnand %p896_p11, %p890_p5 }
 0x235   : > { %900 = shalt.err (!%p897_p13)
}
 0x236   : > { %780 = dma.vmem_to_hbm [thread:$0]  (%p1099_p10), %s553_s12, 128, %s1184_s23, %s539_s28  }
 0x237 PF: > { %p786_p0 = scmp.ge.s32.totalorder %s983_s27, 2  ;;  %s564_s22 = sand.u32 1, %s947_s18  }
 0x238   : > { %s565_s25 = scalar_lea.sflag [#allocation5], %s564_s22 }
 0x239   : > { %p783_p1 = pnand %p786_p0, %p1106_p12 }
 0x23b   : > { %942 = dma.done.wait (!%p783_p1), %s565_s25, 128  }
 0x23c   : > { %944 = vsyncadd (!%p783_p1), %s565_s25, 4294967168  ;;  %s18_s27 = sadd.s32 1, %s983_s27   ;;  %s1266_s26 = sld [smem:[#allocation13_spill]] }
 0x23d   : > { %p15_p2 = scmp.ge.s32.totalorder %s18_s27, 6   ;;  %s1267_s21 = sld [smem:[#allocation7_spill]] }
 0x23e   : > { %s1268_s22 = sld [smem:[#allocation12_spill]]  ;;  %s1269_s23 = sld [smem:[#allocation8_spill]] }
 0x23f   : > { %s1270_s24 = sld [smem:[#allocation9_spill]]  ;;  %s1271_s25 = sld [smem:[#allocation10_spill]] }
 0x240   : > { %s1272_s13 = sld [smem:[#allocation11_spill]]  ;;  %s1273_s18 = smov %s951_s19 }
 0x241   : > { %s1274_s19 = smov %s955_s20  ;;  %17 = sbr.rel (!%p15_p2) target bundleno = 8 (0x8), region = 135 }
 0x242   : > { %s1275_s20 = smov %s1266_s26 }
 0x246   : > { %s1276_s26 = smov %s1272_s13 }
 0x248   :  { %570 = vsyncpa [#allocation5], 1 }
 0x249   :  { %572 = vsyncpa [#allocation5 + $0x1], 1 }

</bundles_post_ra>
